<compile_context>
chip_gen: v7x
topology: tpu7x:2x2x1
jax: 0.10.0
libtpu: 0.0.40
codegen_flags: <defaults>
</compile_context>

<pallas_src>
import jax
import jax.numpy as jnp
import numpy as np
from jax.experimental import pallas as pl
from jax.experimental.pallas import tpu as pltpu


# ------------------------------- the kernel --------------------------------

def predictor_kernel(x_ref, w_ref, out_ref, acc_ref):
    # x_ref:   (TM, TK)  row/K tile of the flattened activations
    # w_ref:   (TK, TN)  K/N tile of the (transposed) weight
    # out_ref: (TM, TN)
    # acc_ref: (TM, TN)  f32 accumulator, persists across the K grid axis
    k = pl.program_id(2)

    @pl.when(k == 0)
    def _():
        acc_ref[...] = jnp.zeros_like(acc_ref)

    acc_ref[...] += jnp.dot(
        x_ref[...], w_ref[...], preferred_element_type=jnp.float32
    )

    @pl.when(k == pl.num_programs(2) - 1)
    def _():
        out_ref[...] = acc_ref[...].astype(out_ref.dtype)


# ------------------------------- the wrapper --------------------------------

def _round_up(x, m):
    return ((x + m - 1) // m) * m


def predictor(data, w_t, *, block_rows=512, block_cols=512, block_k=1024):
    """data: [..., dim]; w_t: [dim, num_types] (transpose of the PyTorch weight)."""
    orig_shape = data.shape
    dim = orig_shape[-1]
    num_types = w_t.shape[1]
    M = int(np.prod(orig_shape[:-1]))

    x2 = data.reshape(M, dim)

    # --- pick tiles: full extent when small, 128-aligned blocks when large ---
    tm = min(block_rows, _round_up(M, 8))
    if num_types <= block_cols:
        tn, n_pad = num_types, num_types           # full-extent N block
    else:
        tn, n_pad = block_cols, _round_up(num_types, block_cols)
    if dim <= block_k:
        tk, k_pad = dim, dim                       # full-extent K block
    else:
        tk, k_pad = block_k, _round_up(dim, block_k)
    m_pad = _round_up(M, tm)

    # --- pad operands up to tile multiples (sliced off afterwards) ---
    if (m_pad, k_pad) != (M, dim):
        x2 = jnp.pad(x2, ((0, m_pad - M), (0, k_pad - dim)))
    w2 = w_t
    if (k_pad, n_pad) != (dim, num_types):
        w2 = jnp.pad(w2, ((0, k_pad - dim), (0, n_pad - num_types)))

    grid = (m_pad // tm, n_pad // tn, k_pad // tk)

    out = pl.pallas_call(
        predictor_kernel,
        grid=grid,
        in_specs=[
            pl.BlockSpec((tm, tk), lambda i, j, k: (i, k)),   # activation tile
            pl.BlockSpec((tk, tn), lambda i, j, k: (k, j)),   # weight tile
        ],
        out_specs=pl.BlockSpec((tm, tn), lambda i, j, k: (i, j)),
        out_shape=jax.ShapeDtypeStruct((m_pad, n_pad), data.dtype),
        scratch_shapes=[pltpu.VMEM((tm, tn), jnp.float32)],
        compiler_params=pltpu.CompilerParams(
            dimension_semantics=("parallel", "parallel", "arbitrary"),
        ),
    )(x2, w2)

    return out[:M, :num_types].reshape(*orig_shape[:-1], num_types)


# --------------------------- pure-JAX reference -----------------------------

def predictor_ref(data, w_t):
    return data @ w_t


# ----------------------------------- main ------------------------------------

if __name__ == "__main__":
    B, L, dim, num_types = 2, 8, 32, 16

    key = jax.random.PRNGKey(0)
    k_w, k_x = jax.random.split(key)

    # xavier-normal init for the [num_types, dim] PyTorch weight, stored
    # transposed ([dim, num_types]) so the kernel computes data @ W.T directly.
    std = float(np.sqrt(2.0 / (dim + num_types)))
    w_t = (std * jax.random.normal(k_w, (dim, num_types))).astype(jnp.float32)

    data = jax.random.normal(k_x, (B, L, dim), dtype=jnp.float32)

    out = predictor(data, w_t)
    out = jax.block_until_ready(out)

    ref = predictor_ref(data, w_t)
    np.testing.assert_allclose(np.asarray(out), np.asarray(ref), rtol=1e-5, atol=1e-5)

    print("KERNEL_OK")
</pallas_src>

<mosaic_0001>
module attributes {stable_mosaic.version = 11 : i64} {
  func.func @predictor_kernel(%arg0: i32, %arg1: i32, %arg2: i32, %arg3: memref<16x32xf32, #tpu.memory_space<vmem>>, %arg4: memref<32x16xf32, #tpu.memory_space<vmem>>, %arg5: memref<16x16xf32, #tpu.memory_space<vmem>>, %arg6: memref<16x16xf32, #tpu.memory_space<vmem>>) attributes {dimension_semantics = [#tpu.dimension_semantics<parallel>, #tpu.dimension_semantics<parallel>, #tpu.dimension_semantics<arbitrary>], iteration_bounds = array<i64: 1, 1, 1>, scalar_prefetch = 0 : i64, scratch_operands = 1 : i64, tpu.core_type = #tpu.core_type<tc>, window_params = [{transform_indices = @transform_0, window_bounds = array<i64: 16, 32>}, {transform_indices = @transform_1, window_bounds = array<i64: 32, 16>}, {transform_indices = @transform_2, window_bounds = array<i64: 16, 16>}]} {
    %c0_i32 = arith.constant 0 : i32
    %0 = arith.cmpi eq, %arg2, %c0_i32 : i32
    %1 = arith.extui %0 : i1 to i32
    %c0_i32_0 = arith.constant 0 : i32
    %2 = arith.cmpi ne, %1, %c0_i32_0 : i32
    scf.if %2 {
      %cst_10 = arith.constant 0.000000e+00 : f32
      %12 = vector.broadcast %cst_10 : f32 to vector<16x16xf32>
      %c0_11 = arith.constant 0 : index
      %c0_12 = arith.constant 0 : index
      %13 = vector.load %arg6[%c0_11, %c0_12] : memref<16x16xf32, #tpu.memory_space<vmem>>, vector<16x16xf32>
      tpu.vector_store %arg6[%c0_11, %c0_12], %12 {strides = array<i32>} : memref<16x16xf32, #tpu.memory_space<vmem>>, vector<16x16xf32>,
    } else {
    }
    %c0 = arith.constant 0 : index
    %c0_1 = arith.constant 0 : index
    %3 = vector.load %arg6[%c0, %c0_1] : memref<16x16xf32, #tpu.memory_space<vmem>>, vector<16x16xf32>
    %c0_2 = arith.constant 0 : index
    %c0_3 = arith.constant 0 : index
    %4 = vector.load %arg3[%c0_2, %c0_3] : memref<16x32xf32, #tpu.memory_space<vmem>>, vector<16x32xf32>
    %c0_4 = arith.constant 0 : index
    %c0_5 = arith.constant 0 : index
    %5 = vector.load %arg4[%c0_4, %c0_5] : memref<32x16xf32, #tpu.memory_space<vmem>>, vector<32x16xf32>
    %cst = arith.constant dense<0.000000e+00> : vector<16x16xf32>
    %6 = tpu.matmul %4, %5, %cst {dimension_numbers = #tpu.dot_dimension_numbers<[1], [0], [0], [1], [0, 0, 1, 1], [], []>} : vector<16x32xf32>, vector<32x16xf32>, vector<16x16xf32> -> vector<16x16xf32>
    %7 = arith.addf %3, %6 : vector<16x16xf32>
    %c0_6 = arith.constant 0 : index
    %c0_7 = arith.constant 0 : index
    %8 = vector.load %arg6[%c0_6, %c0_7] : memref<16x16xf32, #tpu.memory_space<vmem>>, vector<16x16xf32>
    tpu.vector_store %arg6[%c0_6, %c0_7], %7 {strides = array<i32>} : memref<16x16xf32, #tpu.memory_space<vmem>>, vector<16x16xf32>,
    %c0_i32_8 = arith.constant 0 : i32
    %9 = arith.cmpi eq, %arg2, %c0_i32_8 : i32
    %10 = arith.extui %9 : i1 to i32
    %c0_i32_9 = arith.constant 0 : i32
    %11 = arith.cmpi ne, %10, %c0_i32_9 : i32
    scf.if %11 {
      %c0_10 = arith.constant 0 : index
      %c0_11 = arith.constant 0 : index
      %12 = vector.load %arg6[%c0_10, %c0_11] : memref<16x16xf32, #tpu.memory_space<vmem>>, vector<16x16xf32>
      %c0_12 = arith.constant 0 : index
      %c0_13 = arith.constant 0 : index
      %13 = vector.load %arg5[%c0_12, %c0_13] : memref<16x16xf32, #tpu.memory_space<vmem>>, vector<16x16xf32>
      tpu.vector_store %arg5[%c0_12, %c0_13], %12 {strides = array<i32>} : memref<16x16xf32, #tpu.memory_space<vmem>>, vector<16x16xf32>,
    } else {
    }
    return
  }
  func.func @transform_0(%arg0: i32, %arg1: i32, %arg2: i32) -> (i32, i32) {
    %c0_i32 = arith.constant 0 : i32
    return %arg0, %arg2 : i32, i32
  }
  func.func @transform_1(%arg0: i32, %arg1: i32, %arg2: i32) -> (i32, i32) {
    %c0_i32 = arith.constant 0 : i32
    return %arg2, %arg1 : i32, i32
  }
  func.func @transform_2(%arg0: i32, %arg1: i32, %arg2: i32) -> (i32, i32) {
    %c0_i32 = arith.constant 0 : i32
    return %arg0, %arg1 : i32, i32
  }
}

</mosaic_0001>

<bundles_post_ra>
// kernel: tpu_custom_call.1
= control target key start
LH: loop header
LB: loop body
LE: loop exit
PB: predicated region body
PF: predicated region fallthrough
CT: control target
= control target key end

     0   :  { %vm27_vm0 = vcmask 261120   ;;  %vm16_vm1 = vcmask 130048   ;;  %v192_v6 = vmov 0.0   ;;  %s249_s0 = inlined_call_operand.vmem [shape: f32[16,32], index: 0, kind: input, shape index: {}]   ;;  %s250_s1 = inlined_call_operand.vmem [shape: f32[32,16], index: 1, kind: input, shape index: {}]   ;;  %s251_s2 = inlined_call_operand.hbm [shape: f32[16,16], index: 2, kind: output, shape index: {}]  }
   0x1   :  { %v23_v0 = vld [vmem:[%s250_s1] sm:$0xff]  ;;  %v24_v1 = vld [vmem:[%s250_s1 + $0x8] sm:$0xff]  ;;  %v25_v2 = vld [vmem:[%s250_s1 + $0x10] sm:$0xff]  ;;  %18 = vst.msk [vmem:[#allocation2 + $0x8] sm:$0xff] %vm16_vm1, %v192_v6 }
   0x2   :  { %v156_v3 = vpack.c.bf16 %v24_v1, %v23_v0  ;;  %v26_v4 = vld [vmem:[%s250_s1 + $0x18] sm:$0xff]  ;;  %v21_v5 = vld [vmem:[%s249_s0] sm:$0xff]  ;;  %17 = vst.msk [vmem:[#allocation2] sm:$0xff] %vm16_vm1, %v192_v6 }
   0x3   :  { %v160_v7 = vpack.c.bf16 %v26_v4, %v25_v2  ;;  %153 = vmatprep.mubr.msk.f32.mxu0 %vm27_vm0, %v21_v5 }
   0x4   :  { %7 = vsyncpa [#allocation4], 0  ;;  %157 = vmatprep.subr.bf16.mxu0 %v156_v3  ;;  %v22_v8 = vld [vmem:[%s249_s0 + $0x8] sm:$0xff]  ;;  %s193_s1 = smov [#allocation3]  }
   0x5   :  { %159 = vmatpush3.bf16.msra.mxu0 %v156_v3  ;;  %s126_s21 = sshll.u32 %s193_s1, 4  ;;  %s127_s21 = int_to_ptr.vmem [resolvable:$true] %s126_s21 }
   0x6   :  { %161 = vmatprep.subr.bf16.mxu0 %v160_v7  ;;  %s168_s0 = scalar_lea.vmem %s127_s21, 256  ;;  %p173_p1 = scmp.lt.s32.totalorder %s127_s21, %s127_s21 }
   0x7   :  { %p169_p0 = scmp.ne.s32.totalorder %s127_s21, %s168_s0  ;;  %p174_p2 = scmp.lt.s32.totalorder %s168_s0, %s168_s0 }
   0x8   :  { %v20_v9 = vld [vmem:[#allocation2 + $0x8] sm:$0xff] }
   0x9   :  { %163 = vmatpush3.bf16.msra.mxu0 %v160_v7  ;;  %v19_v10 = vld [vmem:[#allocation2] sm:$0xff]  ;;  %p175_p3 = por %p174_p2, %p173_p1 }
   0xb   :  { %p176_p4 = pnand %p175_p3, %p169_p0 }
   0xc   :  { %154 = vmatmul.mubr.msk.f32.vlgmr.msra.gmra.mrb[0].mxu0 %vm27_vm0, %v22_v8 }
  0xdf   :  { %v155_v11 = vpop.f32.mrb[0].mxu0 }
  0xe0   :  { %v110_v12 = vadd.f32 %v155_v11, %v20_v9  ;;  %v100_v13 = vpop.f32.mrb[1].mxu0 }
  0xe1   :  { %v109_v14 = vadd.f32 %v100_v13, %v19_v10 }
  0xe2   :  { %113 = vst.msk [vmem:[#allocation2 + $0x8] sm:$0xff] %vm16_vm1, %v110_v12 }
  0xe3   :  { %112 = vst.msk [vmem:[#allocation2] sm:$0xff] %vm16_vm1, %v109_v14 }
  0xe9   :  { %v118_v15 = vld [vmem:[#allocation2 + $0x8] sm:$0xff] }
  0xea   :  { %v117_v16 = vld [vmem:[#allocation2] sm:$0xff]  ;;  %120 = vst.msk [vmem:[#allocation3 + $0x8] sm:$0xff] %vm16_vm1, %v118_v15 }
  0xeb   :  { %119 = vst.msk [vmem:[#allocation3] sm:$0xff] %vm16_vm1, %v117_v16 }
  0xec   :  { %179 = shalt.err (!%p176_p4)
}
  0xed   :  { %s180_s24 = scalar_lea.hbm %s251_s2, 256 }
  0xee   :  { %p181_p5 = scmp.ne.s32.totalorder %s251_s2, %s180_s24  ;;  %p184_p6 = scmp.lt.u32.totalorder %s180_s24, %s251_s2 }
  0xf0   :  { %p186_p7 = pnand %p184_p6, %p181_p5 }
  0xf2   :  { %189 = shalt.err (!%p186_p7)
}
  0xf3   :  { %s194_s29 = smov 128   ;;  %s195_s30 = smov 8  }
  0xf4   :  { %132 = dma.vmem_to_hbm [thread:$0]  %s127_s21, 256, %s251_s2, [#allocation4], %s194_s29, %s194_s29, %s195_s30  }
  0xf5   :  { %190 = dma.done.wait [#allocation4], 256  }
  0xf6   :  { %191 = vsyncadd [#allocation4], 4294967040 }
  0xf7   :  { %136 = vsyncpa [#allocation4], 1 }

</bundles_post_ra>
